<compile_context>
chip_gen: v6e
topology: v6e:2x2x1
jax: 0.10.0
libtpu: 0.0.40
codegen_flags: <defaults>
</compile_context>

<pallas_src>
import functools

import jax
import jax.numpy as jnp
from jax import lax
from jax.experimental import pallas as pl
from jax.experimental.pallas import tpu as pltpu

_VMEM_LIMIT_BYTES = 32 * 1024 * 1024   # scoped VMEM limit: safe on v5e/v6e/v7x
_TILE_VMEM_BUDGET = 16 * 1024 * 1024   # double-buffered tiles + f32 temporaries
_LANES = 128


def _softmax_classes(x):
    """Softmax over axis 0 (classes) of a (C, TR, 128) f32 tile.

    The class axis is an outer dim in the rows-on-sublanes layout, so max/sum
    are pure VPU elementwise across slabs; the divide goes to the EUP.
    """
    m = jnp.max(x, axis=0, keepdims=True)
    e = jnp.exp(x - m)
    s = jnp.sum(e, axis=0, keepdims=True)
    return e * pl.reciprocal(s, approx=False)


def _dice_kernel(p_ref, l_ref, inter_ref, denom_ref, inter_acc, denom_acc, *,
                 s_true, r_ps, need_mask, need_softmax, label_softmax,
                 index_labels):
    """Grid = (B, n_split, n_row_tiles); axis 2 reduces rows within a split.

    p_ref   : (1, C, 1, TR, 128) predict tile (native dtype, upcast here)
    l_ref   : (1, C, 1, TR, 128) dense labels  OR  (1, 1, 1, TR, 128) indices
    inter_ref / denom_ref : (1, 1, C, 128) f32 lane-resident partial outputs
    inter_acc / denom_acc : (C, 128) f32 VMEM accumulators
    """
    sp = pl.program_id(1)          # spatial split (2nd parallel axis for v7x)
    r = pl.program_id(2)           # row-tile index within the split (reduction)

    @pl.when(r == 0)
    def _init():
        inter_acc[...] = jnp.zeros_like(inter_acc)
        denom_acc[...] = jnp.zeros_like(denom_acc)

    c = p_ref.shape[1]
    tr = p_ref.shape[3]

    p = p_ref[...].reshape(c, tr, _LANES).astype(jnp.float32)
    if index_labels:
        # In-kernel one-hot: the B*C*S one-hot stream never touches HBM.
        lab = l_ref[...].reshape(1, tr, _LANES).astype(jnp.int32)
        cls = lax.broadcasted_iota(jnp.int32, (c, tr, _LANES), 0)
        l = (lab == cls).astype(jnp.float32)
    else:
        l = l_ref[...].reshape(c, tr, _LANES).astype(jnp.float32)

    if need_softmax:
        p = _softmax_classes(p)
    if label_softmax:
        l = _softmax_classes(l)

    def _accum(apply_mask):
        pp, ll = p, l
        if apply_mask:
            # Mask (AFTER softmax): rows past this split's extent (garbage
            # from a clamped edge block) and elements past the true spatial
            # size S (zero padding / ragged last 128-row).
            rows = lax.broadcasted_iota(jnp.int32, (1, tr, _LANES), 1) + r * tr
            lanes = lax.broadcasted_iota(jnp.int32, (1, tr, _LANES), 2)
            gpos = (sp * r_ps + rows) * _LANES + lanes
            valid = jnp.logical_and(rows < r_ps, gpos < s_true)
            pp = jnp.where(valid, pp, 0.0)
            ll = jnp.where(valid, ll, 0.0)
        inter_acc[...] += jnp.sum(pp * ll, axis=1)      # (C, 128) lane-resident
        denom_acc[...] += jnp.sum(pp + ll, axis=1)

    if need_mask:
        # Pay for the mask only on tiles that may contain invalid elements.
        may_invalid = jnp.logical_or(
            (sp * r_ps + (r + 1) * tr) * _LANES > s_true,
            (r + 1) * tr > r_ps)
        pl.when(may_invalid)(lambda: _accum(True))
        pl.when(jnp.logical_not(may_invalid))(lambda: _accum(False))
    else:
        _accum(False)

    @pl.when(r == pl.num_programs(2) - 1)
    def _done():
        inter_ref[...] = inter_acc[...][None, None]
        denom_ref[...] = denom_acc[...][None, None]


def _row_multiple(*itemsizes):
    """Sublane granularity for block rows given the streamed input dtypes."""
    m = 8
    for it in itemsizes:
        m = max(m, 32 // max(1, int(it)))
    return m


def _choose_tile_rows(r_ps, per_row_bytes, row_multiple):
    """Largest row-tile whose double-buffered tiles + temps fit the budget."""
    tr = _TILE_VMEM_BUDGET // max(int(per_row_bytes), 1)
    if tr >= r_ps:
        return int(r_ps)                       # whole split per step (full dim)
    tr = max(row_multiple, (tr // row_multiple) * row_multiple)
    return int(min(tr, r_ps))


def _fix_user_tile_rows(tile_rows, r_ps, row_multiple):
    """Round a user-supplied tile_rows to a legal block height."""
    tr = max(1, min(int(tile_rows), r_ps))
    if tr == r_ps:
        return int(r_ps)
    tr = (tr // row_multiple) * row_multiple
    if tr == 0:
        tr = min(row_multiple, r_ps)
    return int(tr)


def dice_loss(predict, label, num_classes, weight=None, label_softmax=False,
              need_softmax=False, tile_rows=None, n_split=None):
    """JAX/Pallas equivalent of DiceLoss.forward.

    predict: [B, C, *spatial].  label: same shape (dense) or [B, *spatial]
    (class indices; one-hot is built inside the kernel).
    """
    B, C = predict.shape[0], predict.shape[1]
    S = 1
    for d in predict.shape[2:]:
        S *= d

    # Stream narrow dtypes natively; upcast to f32 inside the kernel.
    if predict.dtype not in (jnp.float32, jnp.bfloat16, jnp.float16):
        predict = predict.astype(jnp.float32)
    p = predict.reshape(B, C, S)

    index_labels = (label.ndim != predict.ndim)
    if index_labels:
        l = label.reshape(B, 1, S)
        if l.dtype not in (jnp.int32, jnp.int8, jnp.uint8):
            l = l.astype(jnp.int32)
        lc = 1
    else:
        l = label
        if l.dtype == jnp.bool_:
            l = l.astype(jnp.int8)             # bool refs are risky; 1-byte stream
        elif l.dtype not in (jnp.float32, jnp.bfloat16, jnp.float16,
                             jnp.int8, jnp.uint8, jnp.int32):
            l = l.astype(jnp.float32)
        l = l.reshape(B, C, S)
        lc = C

    # Rows-on-sublanes layout: (B, C, n_split, rows_per_split, 128).
    r_valid = -(-S // _LANES)
    if n_split is None:
        # Keep both v7x TensorCores busy when the batch axis alone cannot.
        n_split = 2 if (B % 2 == 1 and r_valid >= 2) else 1
    n_split = max(1, int(n_split))
    r_ps = -(-r_valid // n_split)
    s_pad = n_split * r_ps * _LANES

    if s_pad != S:                              # ragged spatial size only
        p = jnp.pad(p, ((0, 0), (0, 0), (0, s_pad - S)))
        l = jnp.pad(l, ((0, 0), (0, 0), (0, s_pad - S)))
    p = p.reshape(B, C, n_split, r_ps, _LANES)
    l = l.reshape(B, lc, n_split, r_ps, _LANES)

    row_mult = _row_multiple(p.dtype.itemsize, l.dtype.itemsize)
    # Per 128-lane row: double-buffered input streams + f32 working copies,
    # one-hot / softmax / mask temporaries (generous estimate, << 32 MiB limit).
    per_row_bytes = (2 * _LANES * (C * p.dtype.itemsize + lc * l.dtype.itemsize)
                     + _LANES * 4 * (5 * C + 2))
    if tile_rows is None:
        tr = _choose_tile_rows(r_ps, per_row_bytes, row_mult)
    else:
        tr = _fix_user_tile_rows(tile_rows, r_ps, row_mult)
    n_r = -(-r_ps // tr)
    need_mask = (s_pad != S) or (r_ps % tr != 0)

    kernel = functools.partial(
        _dice_kernel, s_true=S, r_ps=r_ps, need_mask=need_mask,
        need_softmax=need_softmax, label_softmax=label_softmax,
        index_labels=index_labels)

    n_sm = int(need_softmax) + int(label_softmax)
    cost = pl.CostEstimate(
        flops=int(B * C * s_pad * (4 + 6 * n_sm)),
        transcendentals=int(B * C * s_pad * n_sm),
        bytes_accessed=int(p.size * p.dtype.itemsize
                           + l.size * l.dtype.itemsize
                           + 2 * B * n_split * C * _LANES * 4))

    inter, denom = pl.pallas_call(
        kernel,
        out_shape=(jax.ShapeDtypeStruct((B, n_split, C, _LANES), jnp.float32),
                   jax.ShapeDtypeStruct((B, n_split, C, _LANES), jnp.float32)),
        grid_spec=pltpu.PrefetchScalarGridSpec(
            num_scalar_prefetch=0,
            grid=(B, n_split, n_r),            # batch & split parallel, rows reduce
            in_specs=[
                pl.BlockSpec((1, C, 1, tr, _LANES),
                             lambda b, sp, r: (b, 0, sp, r, 0)),
                pl.BlockSpec((1, lc, 1, tr, _LANES),
                             lambda b, sp, r: (b, 0, sp, r, 0)),
            ],
            out_specs=[
                pl.BlockSpec((1, 1, C, _LANES), lambda b, sp, r: (b, sp, 0, 0)),
                pl.BlockSpec((1, 1, C, _LANES), lambda b, sp, r: (b, sp, 0, 0)),
            ],
            scratch_shapes=[pltpu.VMEM((C, _LANES), jnp.float32)] * 2,
        ),
        compiler_params=pltpu.CompilerParams(
            dimension_semantics=("parallel", "parallel", "arbitrary"),
            vmem_limit_bytes=_VMEM_LIMIT_BYTES,
        ),
        cost_estimate=cost,
    )(p, l)

    # Tiny JAX glue: combine splits + lanes, then the nonlinear dice ratio.
    inter = jnp.sum(inter, axis=(1, 3))                 # (B, C)
    denom = jnp.sum(denom, axis=(1, 3))
    ratios = (2.0 * inter + 1.0) / (denom + 1.0)        # binary_dice per (b, c)

    per_class_dice = jnp.mean(ratios[:, :num_classes], axis=0)
    per_class_loss = 1.0 - per_class_dice
    if weight is not None:
        per_class_loss = jnp.asarray(weight, jnp.float32) * per_class_loss
    return jnp.sum(per_class_loss) / num_classes


def _reference_dice_loss(predict, label, num_classes, weight=None):
    """Pure-JAX reference mirroring the PyTorch code (for sanity checks)."""
    predict = predict.astype(jnp.float32)
    label = label.astype(jnp.float32)
    B = predict.shape[0]
    total = 0.0
    for c in range(num_classes):
        pc = predict[:, c].reshape(B, -1)
        lc = label[:, c].reshape(B, -1)
        dice = 0.0
        for b in range(B):
            inter = jnp.sum(pc[b] * lc[b])
            dice += (2.0 * inter + 1.0) / (jnp.sum(pc[b]) + jnp.sum(lc[b]) + 1.0)
        w = 1.0 if weight is None else weight[c]
        total += w * (1.0 - dice / B)
    return total / num_classes


if __name__ == "__main__":
    num_classes = 4
    key = jax.random.PRNGKey(0)
    keys = jax.random.split(key, 6)

    # Base case: B=2, C=4, 16x16 spatial (NCHW).
    B, C, H, W = 2, 4, 16, 16
    logits = jax.random.normal(keys[0], (B, C, H, W), dtype=jnp.float32)
    predict = jax.nn.softmax(logits, axis=1)
    cls_idx = jax.random.randint(keys[1], (B, H, W), 0, num_classes)
    onehot = jax.nn.one_hot(cls_idx, num_classes, axis=1, dtype=jnp.float32)
    ref = _reference_dice_loss(predict, onehot, num_classes)

    # 1) dense one-hot labels.
    out = jax.block_until_ready(dice_loss(predict, onehot, num_classes))
    assert jnp.allclose(out, ref, atol=1e-5, rtol=1e-5), (out, ref)

    # 2) class-index labels (one-hot built in-kernel).
    out = jax.block_until_ready(dice_loss(predict, cls_idx, num_classes))
    assert jnp.allclose(out, ref, atol=1e-5, rtol=1e-5), (out, ref)

    # 3) fused in-kernel softmax over the class axis on raw logits.
    out = jax.block_until_ready(
        dice_loss(logits, cls_idx, num_classes, need_softmax=True))
    assert jnp.allclose(out, ref, atol=1e-5, rtol=1e-5), (out, ref)

    # 4) per-class weights.
    wgt = jnp.asarray([0.5, 1.0, 1.5, 2.0], jnp.float32)
    ref_w = _reference_dice_loss(predict, onehot, num_classes, weight=wgt)
    out = jax.block_until_ready(dice_loss(predict, cls_idx, num_classes, weight=wgt))
    assert jnp.allclose(out, ref_w, atol=1e-5, rtol=1e-5), (out, ref_w)

    # 5) multi-step reduction + explicit spatial split: 64x64 spatial -> 32
    #    rows of 128 lanes, tile_rows=8, n_split=2 (both TCs on v7x).
    H2, W2 = 64, 64
    logits2 = jax.random.normal(keys[2], (B, C, H2, W2), dtype=jnp.float32)
    predict2 = jax.nn.softmax(logits2, axis=1)
    cls2 = jax.random.randint(keys[3], (B, H2, W2), 0, num_classes)
    onehot2 = jax.nn.one_hot(cls2, num_classes, axis=1, dtype=jnp.float32)
    ref2 = _reference_dice_loss(predict2, onehot2, num_classes)
    out = jax.block_until_ready(
        dice_loss(predict2, onehot2, num_classes, tile_rows=8, n_split=2))
    assert jnp.allclose(out, ref2, atol=1e-5, rtol=1e-5), (out, ref2)

    # 6) ragged spatial size (13x11) -> padding + runtime-gated tail mask,
    #    combined with an explicit split.
    H3, W3 = 13, 11
    logits3 = jax.random.normal(keys[4], (B, C, H3, W3), dtype=jnp.float32)
    predict3 = jax.nn.softmax(logits3, axis=1)
    cls3 = jax.random.randint(keys[5], (B, H3, W3), 0, num_classes)
    onehot3 = jax.nn.one_hot(cls3, num_classes, axis=1, dtype=jnp.float32)
    ref3 = _reference_dice_loss(predict3, onehot3, num_classes)
    out = jax.block_until_ready(dice_loss(predict3, cls3, num_classes, n_split=2))
    assert jnp.allclose(out, ref3, atol=1e-5, rtol=1e-5), (out, ref3)

    # 7) B=1 -> automatic n_split=2 keeps both v7x TensorCores busy.
    ref4 = _reference_dice_loss(predict2[:1], onehot2[:1], num_classes)
    out = jax.block_until_ready(dice_loss(predict2[:1], cls2[:1], num_classes))
    assert jnp.allclose(out, ref4, atol=1e-5, rtol=1e-5), (out, ref4)

    # 8) bf16 predict streamed natively, f32 accumulation in-kernel.
    out = jax.block_until_ready(
        dice_loss(predict.astype(jnp.bfloat16), cls_idx, num_classes))
    assert jnp.allclose(out, ref, atol=2e-2, rtol=2e-2), (out, ref)

    print("KERNEL_OK")
</pallas_src>

<mosaic_0001>
module attributes {stable_mosaic.version = 11 : i64} {
  func.func @_dice_kernel(%arg0: i32, %arg1: i32, %arg2: i32, %arg3: memref<1x4x1x2x128xf32, #tpu.memory_space<vmem>>, %arg4: memref<1x4x1x2x128xf32, #tpu.memory_space<vmem>>, %arg5: memref<1x1x4x128xf32, #tpu.memory_space<vmem>>, %arg6: memref<1x1x4x128xf32, #tpu.memory_space<vmem>>, %arg7: memref<4x128xf32, #tpu.memory_space<vmem>>, %arg8: memref<4x128xf32, #tpu.memory_space<vmem>>) attributes {dimension_semantics = [#tpu.dimension_semantics<parallel>, #tpu.dimension_semantics<parallel>, #tpu.dimension_semantics<arbitrary>], iteration_bounds = array<i64: 2, 1, 1>, scalar_prefetch = 0 : i64, scratch_operands = 2 : i64, tpu.core_type = #tpu.core_type<tc>, window_params = [{transform_indices = @transform_0, window_bounds = array<i64: 1, 4, 1, 2, 128>}, {transform_indices = @transform_1, window_bounds = array<i64: 1, 4, 1, 2, 128>}, {transform_indices = @transform_2, window_bounds = array<i64: 1, 1, 4, 128>}, {transform_indices = @transform_3, window_bounds = array<i64: 1, 1, 4, 128>}]} {
    %c0_i32 = arith.constant 0 : i32
    %0 = arith.cmpi eq, %arg2, %c0_i32 : i32
    %1 = arith.extui %0 : i1 to i32
    %c0_i32_0 = arith.constant 0 : i32
    %2 = arith.cmpi ne, %1, %c0_i32_0 : i32
    scf.if %2 {
      %cst_21 = arith.constant 0.000000e+00 : f32
      %20 = vector.broadcast %cst_21 : f32 to vector<4x128xf32>
      %c0_22 = arith.constant 0 : index
      %c0_23 = arith.constant 0 : index
      %21 = vector.load %arg7[%c0_22, %c0_23] : memref<4x128xf32, #tpu.memory_space<vmem>>, vector<4x128xf32>
      tpu.vector_store %arg7[%c0_22, %c0_23], %20 {strides = array<i32>} : memref<4x128xf32, #tpu.memory_space<vmem>>, vector<4x128xf32>,
      %cst_24 = arith.constant 0.000000e+00 : f32
      %22 = vector.broadcast %cst_24 : f32 to vector<4x128xf32>
      %c0_25 = arith.constant 0 : index
      %c0_26 = arith.constant 0 : index
      %23 = vector.load %arg8[%c0_25, %c0_26] : memref<4x128xf32, #tpu.memory_space<vmem>>, vector<4x128xf32>
      tpu.vector_store %arg8[%c0_25, %c0_26], %22 {strides = array<i32>} : memref<4x128xf32, #tpu.memory_space<vmem>>, vector<4x128xf32>,
    } else {
    }
    %c0 = arith.constant 0 : index
    %c0_1 = arith.constant 0 : index
    %c0_2 = arith.constant 0 : index
    %c0_3 = arith.constant 0 : index
    %c0_4 = arith.constant 0 : index
    %3 = vector.load %arg3[%c0, %c0_1, %c0_2, %c0_3, %c0_4] : memref<1x4x1x2x128xf32, #tpu.memory_space<vmem>>, vector<1x4x1x2x128xf32>
    %4 = vector.shape_cast %3 : vector<1x4x1x2x128xf32> to vector<4x2x128xf32>
    %c0_5 = arith.constant 0 : index
    %c0_6 = arith.constant 0 : index
    %c0_7 = arith.constant 0 : index
    %c0_8 = arith.constant 0 : index
    %c0_9 = arith.constant 0 : index
    %5 = vector.load %arg4[%c0_5, %c0_6, %c0_7, %c0_8, %c0_9] : memref<1x4x1x2x128xf32, #tpu.memory_space<vmem>>, vector<1x4x1x2x128xf32>
    %6 = vector.shape_cast %5 : vector<1x4x1x2x128xf32> to vector<4x2x128xf32>
    %c0_10 = arith.constant 0 : index
    %c0_11 = arith.constant 0 : index
    %7 = vector.load %arg7[%c0_10, %c0_11] : memref<4x128xf32, #tpu.memory_space<vmem>>, vector<4x128xf32>
    %8 = arith.mulf %4, %6 : vector<4x2x128xf32>
    %cst = arith.constant dense<0.000000e+00> : vector<4x128xf32>
    %9 = vector.multi_reduction <add>, %8, %cst [1] : vector<4x2x128xf32> to vector<4x128xf32>
    %10 = arith.addf %7, %9 : vector<4x128xf32>
    %c0_12 = arith.constant 0 : index
    %c0_13 = arith.constant 0 : index
    %11 = vector.load %arg7[%c0_12, %c0_13] : memref<4x128xf32, #tpu.memory_space<vmem>>, vector<4x128xf32>
    tpu.vector_store %arg7[%c0_12, %c0_13], %10 {strides = array<i32>} : memref<4x128xf32, #tpu.memory_space<vmem>>, vector<4x128xf32>,
    %c0_14 = arith.constant 0 : index
    %c0_15 = arith.constant 0 : index
    %12 = vector.load %arg8[%c0_14, %c0_15] : memref<4x128xf32, #tpu.memory_space<vmem>>, vector<4x128xf32>
    %13 = arith.addf %4, %6 : vector<4x2x128xf32>
    %cst_16 = arith.constant dense<0.000000e+00> : vector<4x128xf32>
    %14 = vector.multi_reduction <add>, %13, %cst_16 [1] : vector<4x2x128xf32> to vector<4x128xf32>
    %15 = arith.addf %12, %14 : vector<4x128xf32>
    %c0_17 = arith.constant 0 : index
    %c0_18 = arith.constant 0 : index
    %16 = vector.load %arg8[%c0_17, %c0_18] : memref<4x128xf32, #tpu.memory_space<vmem>>, vector<4x128xf32>
    tpu.vector_store %arg8[%c0_17, %c0_18], %15 {strides = array<i32>} : memref<4x128xf32, #tpu.memory_space<vmem>>, vector<4x128xf32>,
    %c0_i32_19 = arith.constant 0 : i32
    %17 = arith.cmpi eq, %arg2, %c0_i32_19 : i32
    %18 = arith.extui %17 : i1 to i32
    %c0_i32_20 = arith.constant 0 : i32
    %19 = arith.cmpi ne, %18, %c0_i32_20 : i32
    scf.if %19 {
      %c0_21 = arith.constant 0 : index
      %c0_22 = arith.constant 0 : index
      %20 = vector.load %arg7[%c0_21, %c0_22] : memref<4x128xf32, #tpu.memory_space<vmem>>, vector<4x128xf32>
      %21 = vector.shape_cast %20 : vector<4x128xf32> to vector<1x1x4x128xf32>
      %c0_23 = arith.constant 0 : index
      %c0_24 = arith.constant 0 : index
      %c0_25 = arith.constant 0 : index
      %c0_26 = arith.constant 0 : index
      %22 = vector.load %arg5[%c0_23, %c0_24, %c0_25, %c0_26] : memref<1x1x4x128xf32, #tpu.memory_space<vmem>>, vector<1x1x4x128xf32>
      tpu.vector_store %arg5[%c0_23, %c0_24, %c0_25, %c0_26], %21 {strides = array<i32>} : memref<1x1x4x128xf32, #tpu.memory_space<vmem>>, vector<1x1x4x128xf32>,
      %c0_27 = arith.constant 0 : index
      %c0_28 = arith.constant 0 : index
      %23 = vector.load %arg8[%c0_27, %c0_28] : memref<4x128xf32, #tpu.memory_space<vmem>>, vector<4x128xf32>
      %24 = vector.shape_cast %23 : vector<4x128xf32> to vector<1x1x4x128xf32>
      %c0_29 = arith.constant 0 : index
      %c0_30 = arith.constant 0 : index
      %c0_31 = arith.constant 0 : index
      %c0_32 = arith.constant 0 : index
      %25 = vector.load %arg6[%c0_29, %c0_30, %c0_31, %c0_32] : memref<1x1x4x128xf32, #tpu.memory_space<vmem>>, vector<1x1x4x128xf32>
      tpu.vector_store %arg6[%c0_29, %c0_30, %c0_31, %c0_32], %24 {strides = array<i32>} : memref<1x1x4x128xf32, #tpu.memory_space<vmem>>, vector<1x1x4x128xf32>,
    } else {
    }
    return
  }
  func.func @transform_0(%arg0: i32, %arg1: i32, %arg2: i32) -> (i32, i32, i32, i32, i32) {
    %c0_i32 = arith.constant 0 : i32
    %c0_i32_0 = arith.constant 0 : i32
    %c0_i32_1 = arith.constant 0 : i32
    return %arg0, %c0_i32, %arg1, %arg2, %c0_i32_0 : i32, i32, i32, i32, i32
  }
  func.func @transform_1(%arg0: i32, %arg1: i32, %arg2: i32) -> (i32, i32, i32, i32, i32) {
    %c0_i32 = arith.constant 0 : i32
    %c0_i32_0 = arith.constant 0 : i32
    %c0_i32_1 = arith.constant 0 : i32
    return %arg0, %c0_i32, %arg1, %arg2, %c0_i32_0 : i32, i32, i32, i32, i32
  }
  func.func @transform_2(%arg0: i32, %arg1: i32, %arg2: i32) -> (i32, i32, i32, i32) {
    %c0_i32 = arith.constant 0 : i32
    %c0_i32_0 = arith.constant 0 : i32
    %c0_i32_1 = arith.constant 0 : i32
    return %arg0, %arg1, %c0_i32, %c0_i32_0 : i32, i32, i32, i32
  }
  func.func @transform_3(%arg0: i32, %arg1: i32, %arg2: i32) -> (i32, i32, i32, i32) {
    %c0_i32 = arith.constant 0 : i32
    %c0_i32_0 = arith.constant 0 : i32
    %c0_i32_1 = arith.constant 0 : i32
    return %arg0, %arg1, %c0_i32, %c0_i32_0 : i32, i32, i32, i32
  }
}

</mosaic_0001>

<bundles_post_ra>
// kernel: tpu_custom_call.1
= control target key start
LH: loop header
LB: loop body
LE: loop exit
PB: predicated region body
PF: predicated region fallthrough
CT: control target
= control target key end

     0   :  { %s1087_s0 = inlined_call_operand.hbm [shape: f32[2,4,1,2,128], index: 0, kind: input, shape index: {}]   ;;  %s1088_s1 = inlined_call_operand.hbm [shape: f32[2,4,1,2,128], index: 1, kind: input, shape index: {}]   ;;  %s1089_s2 = inlined_call_operand.hbm [shape: f32[2,1,4,128], index: 2, kind: output, shape index: {0}]   ;;  %s1090_s3 = inlined_call_operand.hbm [shape: f32[2,1,4,128], index: 3, kind: output, shape index: {1}]  }
   0x1   :  { %1091 = sst [smem:[#allocation16_spill]] %s1087_s0 }
   0x2   :  { %9 = vsyncpa [#allocation5], 0 }
   0x3   :  { %11 = vsyncpa [#allocation5 + $0x1], 0 }
   0x4   :  { %12 = vsyncpa [#allocation8], 0 }
   0x5   :  { %14 = vsyncpa [#allocation8 + $0x1], 0 }
   0x6   :  { %15 = vsyncpa [#allocation6], 0 }
   0x7   :  { %17 = vsyncpa [#allocation6 + $0x1], 0 }
   0x8   :  { %18 = vsyncpa [#allocation11], 0 }
   0x9   :  { %20 = vsyncpa [#allocation11 + $0x1], 0  ;;  %s861_s12 = smov 0   ;;  %s863_s13 = smov 0  }
   0xa   :  { %s865_s14 = smov 0   ;;  %s867_s15 = smov 0  }
   0xb   :  { %s869_s16 = smov 0   ;;  %s871_s17 = smov 0  }
   0xc LB: > { %s564_s18 = sadd.s32 4294967295, %s832_s17   ;;  %s565_s19 = sadd.s32 4294967294, %s832_s17   ;;  %s832_s17 = sphi %s871_s17, %s26_s17   ;;  %s828_s16 = sphi %s869_s16, %s1103_s16   ;;  %s824_s15 = sphi %s867_s15, %s1102_s15   ;;  %s820_s14 = sphi %s865_s14, %s1101_s14   ;;  %s816_s13 = sphi %s863_s13, %s1100_s13   ;;  %s812_s12 = sphi %s861_s12, %s1099_s12  }
   0xd   : > { %s45_s20 = sadd.s32 1, %s828_s16  ;;  %s56_s21 = sadd.s32 1, %s820_s14 }
   0xe   : > { %p47_p0 = scmp.ge.s32.totalorder %s45_s20, 2  ;;  %p63_p1 = scmp.ne.s32.totalorder %s820_s14, %s816_s13 }
   0xf   : > { %p64_p2 = scmp.eq.s32.totalorder %s832_s17, 0  ;;  %p69_p3 = scmp.ne.s32.totalorder %s816_s13, %s812_s12 }
  0x10   : > { %s1105_s20 = smov (%p47_p0, %s45_s20), 0  ;;  %p70_p5 = scmp.eq.s32.totalorder %s564_s18, 0 }
  0x11   : > { %p902_p4 = por %p64_p2, %p63_p1  ;;  %s49_s23 = ssub.s32 %s828_s16, %s1105_s20 }
  0x12   : > { %p125_p6 = scmp.eq.s32.totalorder %s564_s18, 1  ;;  %p54_p7 = scmp.eq.s32.totalorder %s49_s23, 0 }
  0x13   : > { %p908_p8 = por %p70_p5, %p69_p3  ;;  %p131_p10 = scmp.eq.s32.totalorder %s565_s19, 1 }
  0x14   : > { %p912_p9 = por %p125_p6, %p63_p1  ;;  %p567_p12 = scmp.ge.s32.totalorder %s832_s17, 2 }
  0x15   : > { %s917_s26 = scalar_select %p54_p7, %s820_s14, %s56_s21  }
  0x16   : > { %p919_p11 = por %p131_p10, %p69_p3  ;;  %p609_p13 = scmp.lt.s32.totalorder %s832_s17, 2 }
  0x17   : > { %s926_s28 = sand.u32 1, %s820_s14   ;;  %s585_s30 = sshll.u32 %s828_s16, 7 }
  0x18   : > { %s568_s29 = sshll.u32 %s926_s28, 3  ;;  %s1096_s0 = sld [smem:[#allocation16_spill]] }
  0x19   : > { %s183_s7 = scalar_lea.vmem [#allocation4], %s568_s29  ;;  %p939_p0 = pnand %p609_p13, %p902_p4 }
  0x1a   : > { %s192_s8 = sshll.u32 %s183_s7, 4  ;;  %p574_p1 = scmp.ge.s32.totalorder %s832_s17, 1  ;;  %s193_s8 = int_to_ptr.vmem [resolvable:$true] %s192_s8 }
  0x1b   : > { %s180_s10 = scalar_lea.sflag [#allocation5], %s926_s28  ;;  %p664_p2 = pneg %p939_p0 }
  0x1c   : > { %s675_s11 = scalar_lea.vmem %s193_s8, 128  ;;  %s834_s18 = smov [#allocation4]  }
  0x1d   : > { %p676_p3 = scmp.ne.s32.totalorder %s193_s8, %s675_s11  ;;  %s680_s19 = sshll.u32 %s834_s18, 4  ;;  %s681_s19 = int_to_ptr.vmem [resolvable:$false] %s680_s19 }
  0x1e   : > { %s191_s6 = scalar_lea.hbm %s1096_s0, %s585_s30  ;;  %s682_s21 = scalar_lea.vmem %s681_s19, 256 }
  0x1f   : > { %p678_p5 = pnand %p676_p3, %p664_p2  ;;  %p683_p4 = scmp.lt.s32.totalorder %s193_s8, %s681_s19 }
  0x20   : > { %p684_p7 = scmp.lt.s32.totalorder %s682_s21, %s675_s11 }
  0x21   : > { %p679_p6 = pneg %p678_p5 }
  0x22   : > { %p685_p10 = por %p684_p7, %p683_p4 }
  0x24   : > { %p686_p13 = pnand %p685_p10, %p679_p6 }
  0x26   : > { %689 = shalt.err (!%p686_p13)
}
  0x27   : > { %s835_s22 = smov 32   ;;  %s836_s23 = smov 2  }
  0x28   : > { %598 = dma.hbm_to_vmem [thread:$0]  (!%p939_p0), %s191_s6, 128, %s193_s8, %s180_s10, %s835_s22, %s835_s22, %s836_s23  }
  0x29   : > { %p223_p3 = scmp.lt.s32.totalorder %s832_s17, 3  ;;  %s214_s7 = scalar_lea.hbm %s1088_s1, %s585_s30 }
  0x2a   : > { %s206_s18 = scalar_lea.vmem [#allocation7], %s568_s29  ;;  %s203_s21 = scalar_lea.sflag [#allocation8], %s926_s28 }
  0x2b   : > { %p960_p5 = pnand %p574_p1, %p223_p3  ;;  %s215_s19 = sshll.u32 %s206_s18, 4  ;;  %s216_s19 = int_to_ptr.vmem [resolvable:$true] %s215_s19 }
  0x2c   : > { %s703_s0 = scalar_lea.vmem %s216_s19, 128  ;;  %s837_s6 = smov [#allocation7]  }
  0x2d   : > { %p704_p6 = scmp.ne.s32.totalorder %s216_s19, %s703_s0  ;;  %s708_s8 = sshll.u32 %s837_s6, 4  ;;  %s709_s8 = int_to_ptr.vmem [resolvable:$false] %s708_s8 }
  0x2e   : > { %s710_s30 = scalar_lea.vmem %s709_s8, 256  ;;  %p711_p10 = scmp.lt.s32.totalorder %s216_s19, %s709_s8 }
  0x2f   : > { %p706_p4 = pnand %p704_p6, %p664_p2  ;;  %p712_p1 = scmp.lt.s32.totalorder %s710_s30, %s703_s0 }
  0x31   : > { %p707_p7 = pneg %p706_p4  ;;  %p713_p13 = por %p712_p1, %p711_p10 }
  0x33   : > { %p714_p3 = pnand %p713_p13, %p707_p7 }
  0x35   : > { %717 = shalt.err (!%p714_p3)
}
  0x36   : > { %601 = dma.hbm_to_vmem [thread:$0]  (!%p939_p0), %s214_s7, 128, %s216_s19, %s203_s21, %s835_s22, %s835_s22, %s836_s23  }
  0x37   : > { %227 = sbr.rel (%p960_p5) target bundleno = 130 (0x82), region = 28  ;;  %s975_s28 = sand.u32 (!%p960_p5), 1, %s816_s13  }
  0x38   : > { %s575_s29 = sshll.u32 (!%p960_p5), %s975_s28, 3  ;;  %s230_s10 = scalar_lea.sflag (!%p960_p5), [#allocation5], %s975_s28 }
  0x39   : > { %s233_s4 = scalar_lea.vmem (!%p960_p5), [#allocation4], %s575_s29 }
  0x3c   : > { %795 = dma.done.wait (%p908_p8), %s230_s10, 128  }
  0x3d   : > { %797 = vsyncadd (%p908_p8), %s230_s10, 4294967168  ;;  %s239_s0 = scalar_lea.sflag [#allocation8], %s975_s28  ;;  %s242_s9 = scalar_lea.vmem [#allocation7], %s575_s29 }
  0x3e   : > { %799 = dma.done.wait (%p908_p8), %s239_s0, 128  }
  0x3f   : > { %801 = vsyncadd (%p908_p8), %s239_s0, 4294967168  ;;  %v838_v0 = vmov 0.0   ;;  %vm294_vm0 = vcmask 1041408   ;;  %v281_v1 = vld [vmem:[%s233_s4] sm:$0x3]  ;;  %vm327_vm1 = vcmask 1041409  }
  0x40   : > { %279 = vst [vmem:[#allocation2] sm:$0xf] %v838_v0  ;;  %280 = vst [vmem:[#allocation3] sm:$0xf] %v838_v0  ;;  %v282_v2 = vld [vmem:[%s233_s4 + $0x2] sm:$0x3] }
  0x41   : > { %v283_v3 = vld [vmem:[%s233_s4 + $0x4] sm:$0x3]  ;;  %v284_v4 = vld [vmem:[%s233_s4 + $0x6] sm:$0x3]  ;;  %v285_v5 = vld [vmem:[%s242_s9] sm:$0x3] }
  0x42   : > { %v286_v6 = vld [vmem:[%s242_s9 + $0x2] sm:$0x3]  ;;  %v287_v7 = vld [vmem:[%s242_s9 + $0x4] sm:$0x3]  ;;  %v288_v8 = vld [vmem:[%s242_s9 + $0x6] sm:$0x3]  ;;  %v290_v9 = vmul.f32 %v285_v5, %v281_v1  ;;  %v337_v11 = vadd.f32 %v285_v5, %v281_v1 }
  0x43   : > { %v291_v10 = vmul.f32 %v286_v6, %v282_v2  ;;  %v338_v12 = vadd.f32 %v286_v6, %v282_v2  ;;  %v292_v13 = vmul.f32 %v287_v7, %v283_v3  ;;  %v293_v14 = vmul.f32 %v288_v8, %v284_v4  ;;  %s577_s24 = sshll.u32 %s975_s28, 2  ;;  %s581_s5 = sshll.u32 %s824_s15, 6 }
  0x44   : > { %v339_v15 = vadd.f32 %v287_v7, %v283_v3  ;;  %v340_v16 = vadd.f32 %v288_v8, %v284_v4  ;;  %v295_v17 = vsel %vm294_vm0, %v290_v9, 0.0  ;;  %v341_v19 = vsel %vm294_vm0, %v337_v11, 0.0  ;;  %s267_s22 = scalar_lea.vmem [#allocation9], %s577_s24  ;;  %s1004_s7 = scalar_lea.vmem [#allocation10], %s577_s24 }
  0x45   : > { %v302_v18 = vsel %vm294_vm0, %v291_v10, 0.0  ;;  %v348_v20 = vsel %vm294_vm0, %v338_v12, 0.0  ;;  %v296_v21 = vrot.slane %v295_v17, 4  ;;  %v309_v23 = vsel %vm294_vm0, %v292_v13, 0.0  ;;  %s406_s23 = sshll.u32 %s267_s22, 4  ;;  %s420_s11 = sshll.u32 %s1004_s7, 4  ;;  %s1007_s23 = int_to_ptr.vmem [resolvable:$true] %s406_s23  ;;  %s1014_s11 = int_to_ptr.vmem [resolvable:$true] %s420_s11 }
  0x46   : > { %v303_v22 = vrot.slane %v302_v18, 4  ;;  %v316_v24 = vsel %vm294_vm0, %v293_v14, 0.0  ;;  %v310_v25 = vrot.slane %v309_v23, 4  ;;  %v342_v27 = vrot.slane %v341_v19, 4  ;;  %s1012_s21 = scalar_lea.hbm %s1089_s2, %s581_s5  ;;  %s1019_s8 = scalar_lea.hbm %s1090_s3, %s581_s5 }
  0x47   : > { %v317_v26 = vrot.slane %v316_v24, 4  ;;  %v349_v28 = vrot.slane %v348_v20, 4  ;;  %v297_v29 = vadd.f32 %v296_v21, %v295_v17  ;;  %vm329_vm2 = vcmask 1042434   ;;  %v289_v5 = vld [vmem:[#allocation2] sm:$0xf]  ;;  %s387_s30 = scalar_lea.sflag [#allocation6], %s975_s28 }
  0x48   : > { %v304_v30 = vadd.f32 %v303_v22, %v302_v18  ;;  %v355_v31 = vsel %vm294_vm0, %v339_v15, 0.0  ;;  %v362_v32 = vsel %vm294_vm0, %v340_v16, 0.0  ;;  %v311_v33 = vadd.f32 %v310_v25, %v309_v23  ;;  %v336_v15 = vld [vmem:[#allocation3] sm:$0xf]  ;;  %s718_s29 = scalar_lea.vmem %s1007_s23, 64  ;;  %s839_s10 = smov [#allocation9]  }
  0x49   : > { %v318_v34 = vadd.f32 %v317_v26, %v316_v24  ;;  %vm331_vm3 = vcmask 1043459   ;;  %v343_v35 = vadd.f32 %v342_v27, %v341_v19  ;;  %v350_v36 = vadd.f32 %v349_v28, %v348_v20  ;;  %p719_p8 = scmp.ne.s32.totalorder %s1007_s23, %s718_s29  ;;  %s722_s4 = sshll.u32 %s839_s10, 4  ;;  %s723_s4 = int_to_ptr.vmem [resolvable:$false] %s722_s4 }
  0x4a   : > { %v298_v37 = vrot.slane %v297_v29, 2  ;;  %v305_v38 = vrot.slane %v304_v30, 2  ;;  %v356_v39 = vrot.slane %v355_v31, 4  ;;  %v363_v40 = vrot.slane %v362_v32, 4  ;;  %s724_s0 = scalar_lea.vmem %s723_s4, 128  ;;  %p725_p5 = scmp.lt.s32.totalorder %s1007_s23, %s723_s4 }
  0x4b   : > { %v312_v41 = vrot.slane %v311_v33, 2  ;;  %v319_v42 = vrot.slane %v318_v34, 2  ;;  %v344_v43 = vrot.slane %v343_v35, 2  ;;  %v351_v44 = vrot.slane %v350_v36, 2  ;;  %p720_p0 = pnand %p719_p8, %p912_p9  ;;  %p726_p6 = scmp.lt.s32.totalorder %s724_s0, %s718_s29 }
  0x4c   : > { %v299_v45 = vadd.f32 %v298_v37, %v297_v29  ;;  %v306_v46 = vadd.f32 %v305_v38, %v304_v30  ;;  %v357_v47 = vadd.f32 %v356_v39, %v355_v31  ;;  %v364_v48 = vadd.f32 %v363_v40, %v362_v32 }
  0x4d   : > { %v313_v49 = vadd.f32 %v312_v41, %v311_v33  ;;  %v320_v50 = vadd.f32 %v319_v42, %v318_v34  ;;  %v345_v51 = vadd.f32 %v344_v43, %v343_v35  ;;  %v352_v52 = vadd.f32 %v351_v44, %v350_v36  ;;  %p721_p2 = pneg %p720_p0  ;;  %p727_p4 = por %p726_p6, %p725_p5 }
  0x4e   : > { %v300_v53 = vrot.slane %v299_v45, 1  ;;  %v307_v54 = vrot.slane %v306_v46, 1  ;;  %v358_v55 = vrot.slane %v357_v47, 2  ;;  %v365_v56 = vrot.slane %v364_v48, 2 }
  0x4f   : > { %v314_v57 = vrot.slane %v313_v49, 1  ;;  %v321_v58 = vrot.slane %v320_v50, 1  ;;  %v346_v59 = vrot.slane %v345_v51, 1  ;;  %v353_v60 = vrot.slane %v352_v52, 1  ;;  %p728_p7 = pnand %p727_p4, %p721_p2 }
  0x50   : > { %v301_v61 = vadd.f32 %v300_v53, %v299_v45  ;;  %v308_v62 = vadd.f32 %v307_v54, %v306_v46  ;;  %v359_v63 = vadd.f32 %v358_v55, %v357_v47  ;;  %v366_v0 = vadd.f32 %v365_v56, %v364_v48 }
  0x51   : > { %v315_v1 = vadd.f32 %v314_v57, %v313_v49  ;;  %v322_v2 = vadd.f32 %v321_v58, %v320_v50  ;;  %v347_v3 = vadd.f32 %v346_v59, %v345_v51  ;;  %v354_v4 = vadd.f32 %v353_v60, %v352_v52 }
  0x52   : > { %v328_v6 = vsel %vm327_vm1, %v308_v62, %v301_v61  ;;  %v360_v7 = vrot.slane %v359_v63, 1  ;;  %v367_v8 = vrot.slane %v366_v0, 1 }
  0x53   : > { %v330_v9 = vsel %vm329_vm2, %v315_v1, %v328_v6  ;;  %v373_v10 = vsel %vm327_vm1, %v354_v4, %v347_v3 }
  0x54   : > { %v332_v11 = vsel %vm331_vm3, %v322_v2, %v330_v9  ;;  %v361_v12 = vadd.f32 %v360_v7, %v359_v63  ;;  %v368_v13 = vadd.f32 %v367_v8, %v366_v0 }
  0x55   : > { %v334_v14 = vadd.f32 %v332_v11, %v289_v5 }
  0x56   : > { %v374_v16 = vsel %vm329_vm2, %v361_v12, %v373_v10 }
  0x57   : > { %335 = vst [vmem:[#allocation2] sm:$0xf] %v334_v14  ;;  %v375_v17 = vsel %vm331_vm3, %v368_v13, %v374_v16 }
  0x58   : > { %v377_v18 = vadd.f32 %v375_v17, %v336_v15 }
  0x5a   : > { %378 = vst [vmem:[#allocation3] sm:$0xf] %v377_v18 }
  0x5e   : > { %v382_v19 = vld [vmem:[#allocation2] sm:$0xf] }
  0x5f   : > { %383 = vst [vmem:[%s267_s22] sm:$0xf] %v382_v19 }
  0x60   : > { %731 = shalt.err (!%p728_p7)
}
  0x61   : > { %s732_s9 = scalar_lea.hbm %s1012_s21, 64  ;;  %s736_s5 = scalar_lea.hbm %s1089_s2, 128 }
  0x62   : > { %p733_p10 = scmp.ne.s32.totalorder %s1012_s21, %s732_s9  ;;  %p737_p3 = scmp.lt.s32.totalorder %s1012_s21, %s1089_s2 }
  0x63   : > { %p738_p8 = scmp.lt.s32.totalorder %s736_s5, %s732_s9 }
  0x64   : > { %p734_p1 = pnand %p733_p10, %p912_p9 }
  0x65   : > { %p739_p0 = por %p738_p8, %p737_p3 }
  0x66   : > { %p735_p13 = pneg %p734_p1 }
  0x68   : > { %p740_p2 = pnand %p739_p0, %p735_p13 }
  0x6a   : > { %743 = shalt.err (!%p740_p2)
}
  0x6b   : > { %591 = dma.vmem_to_hbm [thread:$0]  (%p912_p9), %s1007_s23, 64, %s1012_s21, %s387_s30   ;;  %v384_v20 = vld [vmem:[#allocation3] sm:$0xf] }
  0x6c   : > { %385 = vst [vmem:[%s1004_s7] sm:$0xf] %v384_v20  ;;  %s392_s6 = scalar_lea.sflag [#allocation11], %s975_s28  ;;  %s744_s15 = scalar_lea.vmem %s1014_s11, 64 }
  0x6d   : > { %p745_p5 = scmp.ne.s32.totalorder %s1014_s11, %s744_s15  ;;  %s840_s29 = smov [#allocation10]  }
  0x6e   : > { %s748_s10 = sshll.u32 %s840_s29, 4  ;;  %s749_s10 = int_to_ptr.vmem [resolvable:$false] %s748_s10 }
  0x6f   : > { %p746_p6 = pnand %p745_p5, %p912_p9  ;;  %s750_s4 = scalar_lea.vmem %s749_s10, 128 }
  0x70   : > { %p751_p7 = scmp.lt.s32.totalorder %s1014_s11, %s749_s10  ;;  %p752_p10 = scmp.lt.s32.totalorder %s750_s4, %s744_s15 }
  0x71   : > { %p747_p4 = pneg %p746_p6 }
  0x72   : > { %p753_p1 = por %p752_p10, %p751_p7 }
  0x74   : > { %p754_p13 = pnand %p753_p1, %p747_p4 }
  0x76   : > { %757 = shalt.err (!%p754_p13)
}
  0x77   : > { %s758_s23 = scalar_lea.hbm %s1019_s8, 64  ;;  %s762_s21 = scalar_lea.hbm %s1090_s3, 128 }
  0x78   : > { %p759_p3 = scmp.ne.s32.totalorder %s1019_s8, %s758_s23  ;;  %p763_p2 = scmp.lt.s32.totalorder %s1019_s8, %s1090_s3 }
  0x79   : > { %p764_p5 = scmp.lt.s32.totalorder %s762_s21, %s758_s23 }
  0x7a   : > { %p760_p8 = pnand %p759_p3, %p912_p9 }
  0x7b   : > { %p765_p6 = por %p764_p5, %p763_p2 }
  0x7c   : > { %p761_p0 = pneg %p760_p8 }
  0x7e   : > { %p766_p4 = pnand %p765_p6, %p761_p0 }
  0x80   : > { %769 = shalt.err (!%p766_p4)
}
  0x81   : > { %592 = dma.vmem_to_hbm [thread:$0]  (%p912_p9), %s1014_s11, 64, %s1019_s8, %s392_s6  }
  0x82 PF: > { %s432_s9 = sand.u32 1, %s812_s12   ;;  %p603_p7 = pnand %p567_p12, %p919_p11 }
  0x83   : > { %s433_s24 = scalar_lea.sflag [#allocation6], %s432_s9 }
  0x84   : > { %p604_p10 = pneg %p603_p7 }
  0x86   : > { %803 = dma.done.wait (%p604_p10), %s433_s24, 64  }
  0x87   : > { %805 = vsyncadd (%p604_p10), %s433_s24, 4294967232  ;;  %s442_s22 = scalar_lea.sflag [#allocation11], %s432_s9 }
  0x88   : > { %807 = dma.done.wait (%p604_p10), %s442_s22, 64  }
  0x89   : > { %809 = vsyncadd (%p604_p10), %s442_s22, 4294967232  ;;  %s26_s17 = sadd.s32 1, %s832_s17   ;;  %s1099_s12 = smov %s816_s13 }
  0x8a   : > { %p23_p1 = scmp.ge.s32.totalorder %s26_s17, 4   ;;  %s1100_s13 = smov %s820_s14 }
  0x8b   : > { %s1101_s14 = smov %s917_s26  ;;  %s1102_s15 = smov %s828_s16 }
  0x8c   : > { %s1103_s16 = smov %s1105_s20  ;;  %25 = sbr.rel (!%p23_p1) target bundleno = 12 (0xc), region = 111 }
  0x91   :  { %447 = vsyncpa [#allocation5], 1 }
  0x92   :  { %449 = vsyncpa [#allocation5 + $0x1], 1 }
  0x93   :  { %450 = vsyncpa [#allocation8], 1 }
  0x94   :  { %452 = vsyncpa [#allocation8 + $0x1], 1 }
  0x95   :  { %453 = vsyncpa [#allocation6], 1 }
  0x96   :  { %455 = vsyncpa [#allocation6 + $0x1], 1 }
  0x97   :  { %456 = vsyncpa [#allocation11], 1 }
  0x98   :  { %458 = vsyncpa [#allocation11 + $0x1], 1 }

</bundles_post_ra>
